<compile_context>
chip_gen: v7x
topology: tpu7x:2x2x1
jax: 0.10.0
libtpu: 0.0.40
codegen_flags: <defaults>
</compile_context>

<pallas_src>
import jax
import jax.numpy as jnp
from jax.experimental import pallas as pl
from jax.experimental.pallas import tpu as pltpu


def _drop_connect_kernel(scale_ref, x_ref, o_ref):
    """scale_ref: (N, 1) per-sample scale (0 or 1/keep_prob); x_ref/o_ref: (N, TD) tiles."""
    o_ref[...] = (x_ref[...] * scale_ref[...]).astype(o_ref.dtype)


def _pick_tile(d, target_steps=4, max_tile=16384):
    """Lane-dense tile along the flattened feature axis; ~target_steps parallel grid steps."""
    if d % 128 != 0:
        return d                      # full-extent block (legal for any size)
    tile = max(128, min(max_tile, (d // max(target_steps, 1)) // 128 * 128))
    while d % tile != 0:              # tile must evenly divide d (no ragged last step)
        tile -= 128
    return max(tile, 128)


def drop_connect(x, rate, *, key=None, training=False):
    """Forward pass of DropConnect. x: (N, C, H, W) (any trailing dims). Returns same shape."""
    if not 0 <= rate < 1:
        raise ValueError("rate must be 0<=rate<1, got {} instead".format(rate))
    if not training:
        return x                      # eval mode: identity (matches the PyTorch module)

    keep_prob = 1.0 - rate
    n = x.shape[0]
    d = 1
    for s in x.shape[1:]:
        d *= int(s)

    # Per-sample Bernoulli keep mask, exactly as in the module:
    #   binary = floor(keep_prob + U[0,1));  scale = binary / keep_prob  (0 or 1/keep_prob).
    u = jax.random.uniform(key, (n,), dtype=x.dtype)
    binary = jnp.floor(keep_prob + u)
    scale = (binary / keep_prob).reshape(n, 1).astype(jnp.float32)

    x2 = x.reshape(n, d)              # (N, C*H*W): batch on sublanes, lane-dense feature axis
    td = _pick_tile(d)
    grid = (d // td,)

    itemsize = jnp.dtype(x.dtype).itemsize
    cost = pl.CostEstimate(
        flops=n * d,                                  # one multiply per element
        transcendentals=0,
        bytes_accessed=2 * n * d * itemsize + n * 4,  # read x + write y + scale
    )

    out = pl.pallas_call(
        _drop_connect_kernel,
        out_shape=jax.ShapeDtypeStruct((n, d), x.dtype),
        grid_spec=pltpu.PrefetchScalarGridSpec(
            num_scalar_prefetch=0,
            grid=grid,
            in_specs=[
                pl.BlockSpec((n, 1), lambda j: (0, 0)),    # per-sample scale, broadcast in-kernel
                pl.BlockSpec((n, td), lambda j: (0, j)),   # lane-dense activation tile
            ],
            out_specs=pl.BlockSpec((n, td), lambda j: (0, j)),
        ),
        compiler_params=pltpu.CompilerParams(
            dimension_semantics=("parallel",)),            # feature tiles independent -> megacore
        cost_estimate=cost,
    )(scale, x2)
    return out.reshape(x.shape)


def reference(x, rate, key):
    """Pure-JAX reference with the exact PyTorch formulation (div then mul)."""
    keep_prob = 1.0 - rate
    u = jax.random.uniform(key, (x.shape[0],), dtype=x.dtype)
    binary = jnp.floor(keep_prob + u).reshape((-1,) + (1,) * (x.ndim - 1))
    return (x / keep_prob) * binary


if __name__ == "__main__":
    root = jax.random.PRNGKey(0)
    kx, root = jax.random.split(root)
    x = jax.random.normal(kx, (2, 4, 16, 16), jnp.float32)   # NCHW, matching the PyTorch usage

    # Training mode: per-sample Bernoulli drop + 1/keep_prob rescale, verified against reference.
    for rate in (0.5, 0.9):
        kmask, root = jax.random.split(root)
        out = jax.block_until_ready(drop_connect(x, rate, key=kmask, training=True))
        ref = jax.block_until_ready(reference(x, rate, kmask))
        assert out.shape == x.shape, out.shape
        err = float(jnp.max(jnp.abs(out - ref)))
        assert jnp.allclose(out, ref, rtol=1e-5, atol=1e-5), err

    # Eval mode: identity.
    out_eval = jax.block_until_ready(drop_connect(x, 0.5, training=False))
    assert jnp.array_equal(out_eval, x)

    print("KERNEL_OK")
</pallas_src>

<mosaic_0001>
module attributes {stable_mosaic.version = 11 : i64} {
  func.func @_drop_connect_kernel(%arg0: i32, %arg1: memref<2x1xf32, #tpu.memory_space<vmem>>, %arg2: memref<2x256xf32, #tpu.memory_space<vmem>>, %arg3: memref<2x256xf32, #tpu.memory_space<vmem>>) attributes {dimension_semantics = [#tpu.dimension_semantics<parallel>], iteration_bounds = array<i64: 4>, scalar_prefetch = 0 : i64, scratch_operands = 0 : i64, tpu.core_type = #tpu.core_type<tc>, window_params = [{pipeline_mode = #tpu.pipeline_mode<synchronous>, transform_indices = @transform_0, window_bounds = array<i64: 2, 1>}, {transform_indices = @transform_1, window_bounds = array<i64: 2, 256>}, {transform_indices = @transform_2, window_bounds = array<i64: 2, 256>}]} {
    %c0 = arith.constant 0 : index
    %c0_0 = arith.constant 0 : index
    %0 = vector.load %arg2[%c0, %c0_0] : memref<2x256xf32, #tpu.memory_space<vmem>>, vector<2x256xf32>
    %c0_1 = arith.constant 0 : index
    %c0_2 = arith.constant 0 : index
    %1 = vector.load %arg1[%c0_1, %c0_2] : memref<2x1xf32, #tpu.memory_space<vmem>>, vector<2x1xf32>
    %2 = vector.broadcast %1 : vector<2x1xf32> to vector<2x256xf32>
    %3 = arith.mulf %0, %2 : vector<2x256xf32>
    %c0_3 = arith.constant 0 : index
    %c0_4 = arith.constant 0 : index
    %4 = vector.load %arg3[%c0_3, %c0_4] : memref<2x256xf32, #tpu.memory_space<vmem>>, vector<2x256xf32>
    tpu.vector_store %arg3[%c0_3, %c0_4], %3 {strides = array<i32>} : memref<2x256xf32, #tpu.memory_space<vmem>>, vector<2x256xf32>,
    return
  }
  func.func @transform_0(%arg0: i32) -> (i32, i32) {
    %c0_i32 = arith.constant 0 : i32
    %c0_i32_0 = arith.constant 0 : i32
    %c0_i32_1 = arith.constant 0 : i32
    return %c0_i32, %c0_i32_0 : i32, i32
  }
  func.func @transform_1(%arg0: i32) -> (i32, i32) {
    %c0_i32 = arith.constant 0 : i32
    %c0_i32_0 = arith.constant 0 : i32
    return %c0_i32, %arg0 : i32, i32
  }
  func.func @transform_2(%arg0: i32) -> (i32, i32) {
    %c0_i32 = arith.constant 0 : i32
    %c0_i32_0 = arith.constant 0 : i32
    return %c0_i32, %arg0 : i32, i32
  }
}

</mosaic_0001>

<bundles_post_ra>
// kernel: tpu_custom_call.1
= control target key start
LH: loop header
LB: loop body
LE: loop exit
PB: predicated region body
PF: predicated region fallthrough
CT: control target
= control target key end

     0   :  { %7 = vsyncpa [#allocation3], 0  ;;  %s607_s0 = inlined_call_operand.vmem [shape: f32[2,1], index: 0, kind: input, shape index: {}]   ;;  %s608_s1 = inlined_call_operand.hbm [shape: f32[2,1024], index: 1, kind: input, shape index: {}]   ;;  %s609_s2 = inlined_call_operand.hbm [shape: f32[2,1024], index: 2, kind: output, shape index: {}]  }
   0x1   :  { %9 = vsyncpa [#allocation3 + $0x1], 0 }
   0x2   :  { %10 = vsyncpa [#allocation4], 0 }
   0x3   :  { %12 = vsyncpa [#allocation4 + $0x1], 0  ;;  %s445_s9 = smov 0   ;;  %s447_s10 = smov 0  }
   0x4   :  { %s449_s11 = smov 0   ;;  %s451_s12 = smov 0  }
   0x5 LB: > { %s466_s13 = sadd.s32 4294967295, %s424_s12   ;;  %s263_s14 = sadd.s32 4294967294, %s424_s12   ;;  %s424_s12 = sphi %s451_s12, %s623_s12   ;;  %s420_s11 = sphi %s449_s11, %s622_s11   ;;  %s416_s10 = sphi %s447_s10, %s621_s10   ;;  %s412_s9 = sphi %s445_s9, %s620_s9  }
   0x6   : > { %s470_s15 = sadd.s32 1, %s424_s12   ;;  %s46_s16 = sadd.s32 1, %s420_s11 }
   0x7   : > { %s43_s17 = ssub.s32 %s424_s12, %s470_s15  ;;  %p53_p0 = scmp.ne.s32.totalorder %s420_s11, %s416_s10 }
   0x8   : > { %p44_p1 = scmp.eq.s32.totalorder %s43_s17, 0  ;;  %p54_p2 = scmp.eq.s32.totalorder %s424_s12, 0 }
   0x9   : > { %p59_p3 = scmp.ne.s32.totalorder %s416_s10, %s412_s9  ;;  %p60_p4 = scmp.eq.s32.totalorder %s466_s13, 0 }
   0xa   : > { %s482_s18 = scalar_select %p44_p1, %s420_s11, %s46_s16  }
   0xb   : > { %p484_p5 = por %p54_p2, %p53_p0  ;;  %p488_p6 = por %p60_p4, %p59_p3 }
   0xc   : > { %p83_p7 = scmp.eq.s32.totalorder %s466_s13, 3  ;;  %p89_p8 = scmp.eq.s32.totalorder %s263_s14, 3 }
   0xd   : > { %p291_p9 = scmp.lt.s32.totalorder %s424_s12, 4  ;;  %s112_s23 = sand.u32 1, %s420_s11  }
   0xe   : > { %p494_p10 = por %p83_p7, %p53_p0  ;;  %p498_p11 = por %p89_p8, %p59_p3 }
   0xf   : > { %s277_s24 = sshll.u32 %s424_s12, 6  ;;  %s266_s25 = sshll.u32 %s112_s23, 2 }
  0x10   : > { %s613_s21 = scalar_select %p494_p10, 1, 0 }
  0x11   : > { %s614_s22 = scalar_select %p498_p11, 1, 0 }
  0x12   : > { %s507_s28 = scalar_lea.hbm %s608_s1, %s277_s24  ;;  %s116_s29 = scalar_lea.vmem [#allocation2], %s266_s25 }
  0x13   : > { %s124_s30 = sshll.u32 %s116_s29, 4  ;;  %p511_p12 = pnand %p291_p9, %p484_p5  ;;  %s515_s30 = int_to_ptr.vmem [resolvable:$true] %s124_s30 }
  0x14   : > { %s113_s4 = scalar_lea.sflag [#allocation3], %s112_s23  ;;  %s328_s5 = scalar_lea.hbm %s507_s28, 64 }
  0x15   : > { %p329_p1 = scmp.ne.s32.totalorder %s507_s28, %s328_s5  ;;  %p330_p2 = pneg %p511_p12 }
  0x16   : > { %s333_s8 = scalar_lea.hbm %s608_s1, 256  ;;  %p334_p5 = scmp.lt.u32.totalorder %s507_s28, %s608_s1 }
  0x17   : > { %p331_p3 = pnand %p330_p2, %p329_p1  ;;  %p335_p7 = scmp.lt.u32.totalorder %s333_s8, %s328_s5 }
  0x18   : > { %p337_p9 = scmp.lt.u32.totalorder %s328_s5, %s507_s28 }
  0x19   : > { %p332_p4 = pneg %p331_p3  ;;  %p336_p8 = por %p335_p7, %p334_p5 }
  0x1b   : > { %p338_p13 = por %p337_p9, %p336_p8 }
  0x1d   : > { %p339_p0 = pnand %p338_p13, %p332_p4 }
  0x1f   : > { %342 = shalt.err (!%p339_p0)
}
  0x20   : > { %s343_s17 = scalar_lea.vmem %s515_s30, 64  ;;  %s426_s19 = smov [#allocation2]  }
  0x21   : > { %p344_p1 = scmp.ne.s32.totalorder %s515_s30, %s343_s17  ;;  %s348_s23 = sshll.u32 %s426_s19, 4  ;;  %s349_s23 = int_to_ptr.vmem [resolvable:$false] %s348_s23 }
  0x22   : > { %s350_s24 = scalar_lea.vmem %s349_s23, 128  ;;  %p351_p10 = scmp.lt.s32.totalorder %s515_s30, %s349_s23 }
  0x23   : > { %p346_p3 = pnand %p344_p1, %p330_p2  ;;  %p352_p5 = scmp.lt.s32.totalorder %s350_s24, %s343_s17 }
  0x25   : > { %p347_p11 = pneg %p346_p3  ;;  %p353_p7 = por %p352_p5, %p351_p10 }
  0x27   : > { %p354_p8 = pnand %p353_p7, %p347_p11 }
  0x29   : > { %357 = shalt.err (!%p354_p8)
}
  0x2a   : > { %286 = dma.hbm_to_vmem [thread:$0]  (!%p511_p12), %s507_s28, 64, %s515_s30, %s113_s4  }
  0x2b   : > { %p616_p13 = scmp.lt.s32.totalorder %s424_s12, 5  ;;  %p617_p0 = scmp.ge.s32.totalorder %s424_s12, 1 }
  0x2d   : > { %p130_p2 = pnand %p617_p0, %p616_p13 }
  0x2e   : > { %s549_s25 = sand.u32 (!%p130_p2), 1, %s416_s10  }
  0x2f   : > { %133 = sbr.rel (%p130_p2) target bundleno = 203 (0xcb), region = 28  ;;  %s270_s26 = sshll.u32 (!%p130_p2), %s549_s25, 2 }
  0x30   : > { %s136_s27 = scalar_lea.sflag (!%p130_p2), [#allocation3], %s549_s25  ;;  %s139_s29 = scalar_lea.vmem (!%p130_p2), [#allocation2], %s270_s26 }
  0x36   : > { %403 = dma.done.wait (%p488_p6), %s136_s27, 64  }
  0x37   : > { %405 = vsyncadd (%p488_p6), %s136_s27, 4294967232  ;;  %v427_v0 = vmov 0   ;;  %v163_v1 = vld [vmem:[%s607_s0] sm:$0x3]  ;;  %v428_v2 = vmov 269488144   ;;  %v171_v4 = vlaneseq }
  0x38   : > { %327 = vset.pattern.permute.xlu0 %v427_v0  ;;  %v169_v3 = vunpack.c.l.s4 %v428_v2  ;;  %v162_v9 = vld [vmem:[%s139_s29] sm:$0xf]  ;;  %s278_s20 = sshll.u32 %s466_s13, 6  ;;  %s159_s3 = scalar_lea.vmem [#allocation5], %s270_s26 }
  0x39   : > { %166 = vperm.xlu0 %327, %v163_v1   ;;  %v172_v6 = vshrl.u32 %v171_v4, 7  ;;  %s193_s4 = sshll.u32 %s159_s3, 4  ;;  %s564_s7 = scalar_lea.hbm %s609_s2, %s278_s20  ;;  %s566_s4 = int_to_ptr.vmem [resolvable:$true] %s193_s4 }
  0x3a   : > { %v170_v5 = vunpack.c.0.s8 %v169_v3  ;;  %s179_s8 = scalar_lea.sflag [#allocation4], %s549_s25  ;;  %s358_s14 = scalar_lea.vmem %s566_s4, 64 }
  0x3b   : > { %p359_p6 = scmp.ne.s32.totalorder %s566_s4, %s358_s14  ;;  %p618_p10 = scmp.ne.s32.totalorder %s613_s21, 0 }
  0x3c   : > { %v173_v7 = vsub.s32 %v170_v5, %v172_v6  ;;  %s429_s13 = smov [#allocation5]  }
  0x3d   : > { %p360_p11 = pnand %p359_p6, %p618_p10  ;;  %s362_s16 = sshll.u32 %s429_s13, 4  ;;  %s363_s16 = int_to_ptr.vmem [resolvable:$false] %s362_s16 }
  0x3e   : > { %s364_s17 = scalar_lea.vmem %s363_s16, 128  ;;  %p365_p4 = scmp.lt.s32.totalorder %s566_s4, %s363_s16 }
  0x3f   : > { %p361_p12 = pneg %p360_p11  ;;  %p366_p9 = scmp.lt.s32.totalorder %s364_s17, %s358_s14 }
  0x41   : > { %p367_p1 = por %p366_p9, %p365_p4 }
  0x43   : > { %p368_p3 = pnand %p367_p1, %p361_p12 }
  0xb8   : > { %v167_v8 = vpop.permute.xlu0 %166 }
  0xb9   : > { %v174_v10 = vrot.slane %v167_v8, %v173_v7 }
  0xbb   : > { %v176_v11 = vmul.f32 %v174_v10, %v162_v9 }
  0xbd   : > { %177 = vst [vmem:[%s159_s3] sm:$0xf] %v176_v11 }
  0xbe   : > { %371 = shalt.err (!%p368_p3)
}
  0xbf   : > { %s372_s19 = scalar_lea.hbm %s564_s7, 64  ;;  %s376_s25 = scalar_lea.hbm %s609_s2, 256 }
  0xc0   : > { %p373_p5 = scmp.ne.s32.totalorder %s564_s7, %s372_s19  ;;  %p377_p13 = scmp.lt.u32.totalorder %s564_s7, %s609_s2 }
  0xc1   : > { %p378_p0 = scmp.lt.u32.totalorder %s376_s25, %s372_s19  ;;  %p380_p6 = scmp.lt.u32.totalorder %s372_s19, %s564_s7 }
  0xc2   : > { %p374_p7 = pnand %p373_p5, %p618_p10 }
  0xc3   : > { %p379_p2 = por %p378_p0, %p377_p13 }
  0xc4   : > { %p375_p8 = pneg %p374_p7 }
  0xc5   : > { %p381_p11 = por %p380_p6, %p379_p2 }
  0xc7   : > { %p382_p12 = pnand %p381_p11, %p375_p8 }
  0xc9   : > { %385 = shalt.err (!%p382_p12)
}
  0xca   : > { %281 = dma.vmem_to_hbm [thread:$0]  (%p618_p10), %s566_s4, 64, %s564_s7, %s179_s8  }
  0xcb PF: > { %p292_p4 = scmp.ge.s32.totalorder %s424_s12, 2  ;;  %s205_s29 = sand.u32 1, %s412_s9  }
  0xcc   : > { %p619_p9 = scmp.ne.s32.totalorder %s614_s22, 0  ;;  %s206_s28 = scalar_lea.sflag [#allocation4], %s205_s29 }
  0xce   : > { %p288_p1 = pnand %p292_p4, %p619_p9 }
  0xd0   : > { %407 = dma.done.wait (!%p288_p1), %s206_s28, 64  }
  0xd1   : > { %409 = vsyncadd (!%p288_p1), %s206_s28, 4294967232  ;;  %p15_p3 = scmp.ge.s32.totalorder %s470_s15, 6   ;;  %s620_s9 = smov %s416_s10 }
  0xd2   : > { %s621_s10 = smov %s420_s11  ;;  %s622_s11 = smov %s482_s18 }
  0xd3   : > { %s623_s12 = smov %s470_s15  ;;  %17 = sbr.rel (!%p15_p3) target bundleno = 5 (0x5), region = 73 }
  0xda   :  { %211 = vsyncpa [#allocation3], 1 }
  0xdb   :  { %213 = vsyncpa [#allocation3 + $0x1], 1 }
  0xdc   :  { %214 = vsyncpa [#allocation4], 1 }
  0xdd   :  { %216 = vsyncpa [#allocation4 + $0x1], 1 }

</bundles_post_ra>
